<compile_context>
chip_gen: v7x
topology: tpu7x:2x2x1
jax: 0.10.0
libtpu: 0.0.40
codegen_flags: <defaults>
</compile_context>

<pallas_src>
import functools

import jax
import jax.numpy as jnp
from jax.experimental import pallas as pl
from jax.experimental.pallas import tpu as pltpu


def _smape_kernel(forecast_ref, target_ref, mask_ref, out_ref, acc_ref, *,
                  batch, time, tb, tt, mask_rows, mask_cols):
    i = pl.program_id(0)          # batch-block index (parallel)
    j = pl.program_id(1)          # time-block index (reduction, innermost)

    @pl.when(j == 0)
    def _():
        acc_ref[...] = jnp.zeros_like(acc_ref)

    f = forecast_ref[...].astype(jnp.float32)
    t = target_ref[...].astype(jnp.float32)
    m = mask_ref[...].astype(jnp.float32)

    num = jnp.abs(f - t)
    den = jnp.abs(f) + jnp.abs(t)
    r = num / den
    # divide_no_nan: NaN -> 0, +inf -> 0 (matches the torch helper).
    bad = jnp.isnan(r) | (r == jnp.inf)
    contrib = jnp.where(bad, 0.0, r * m)

    # Zero contributions from out-of-bounds (tail-padded) rows / columns.
    # These branches are Python-static: no masking code is emitted when the
    # array dims divide the tile dims exactly.
    if mask_rows or mask_cols:
        valid = None
        if mask_rows:
            row = jax.lax.broadcasted_iota(jnp.int32, (tb, tt), 0) + i * tb
            valid = row < batch
        if mask_cols:
            col = jax.lax.broadcasted_iota(jnp.int32, (tb, tt), 1) + j * tt
            cvalid = col < time
            valid = cvalid if valid is None else (valid & cvalid)
        contrib = jnp.where(valid, contrib, 0.0)

    # Pure elementwise accumulation every step (no per-step XLU reduce).
    acc_ref[...] += contrib

    # One full reduce per batch block, stored to this block's private partial.
    @pl.when(j == pl.num_programs(1) - 1)
    def _():
        out_ref[...] = jnp.sum(acc_ref[...]).reshape(1, 1, 1)


def _round_up(x, m):
    return ((x + m - 1) // m) * m


def smape_loss(insample, freq, forecast, target, mask, *,
               batch_tile=512, time_tile=1024):
    """Pallas implementation of smape_loss.forward. Returns a scalar float32."""
    del insample, freq  # unused in the reference forward pass
    B, T = forecast.shape
    assert target.shape == (B, T) and mask.shape == (B, T)

    # Clamp tiles to the (8,128)-rounded array dims so small inputs still work.
    tb = min(batch_tile, _round_up(B, 8))
    tt = min(time_tile, _round_up(T, 128))
    n_b = pl.cdiv(B, tb)
    n_t = pl.cdiv(T, tt)

    kernel = functools.partial(
        _smape_kernel,
        batch=B, time=T, tb=tb, tt=tt,
        mask_rows=(B % tb != 0), mask_cols=(T % tt != 0))

    partials = pl.pallas_call(
        kernel,
        out_shape=jax.ShapeDtypeStruct((n_b, 1, 1), jnp.float32),
        grid_spec=pltpu.PrefetchScalarGridSpec(
            num_scalar_prefetch=0,
            grid=(n_b, n_t),
            in_specs=[
                pl.BlockSpec((tb, tt), lambda i, j: (i, j)),
                pl.BlockSpec((tb, tt), lambda i, j: (i, j)),
                pl.BlockSpec((tb, tt), lambda i, j: (i, j)),
            ],
            out_specs=pl.BlockSpec((1, 1, 1), lambda i, j: (i, 0, 0)),
            scratch_shapes=[pltpu.VMEM((tb, tt), jnp.float32)],
        ),
        compiler_params=pltpu.CompilerParams(
            dimension_semantics=("parallel", "arbitrary"),
            vmem_limit_bytes=48 * 1024 * 1024),
    )(forecast, target, mask)

    # Finish the mean (and the 200x scale) on the tiny per-block partials.
    return 200.0 * jnp.sum(partials) / (B * T)


def _reference(forecast, target, mask):
    f = forecast.astype(jnp.float32)
    t = target.astype(jnp.float32)
    num = jnp.abs(f - t)
    den = jnp.abs(f) + jnp.abs(t)
    r = num / den
    r = jnp.where(jnp.isnan(r), 0.0, r)
    r = jnp.where(r == jnp.inf, 0.0, r)
    return 200.0 * jnp.mean(r * mask.astype(jnp.float32))


if __name__ == "__main__":
    key = jax.random.PRNGKey(0)
    k1, k2, k3, k4 = jax.random.split(key, 4)

    # Case 1: small shape with non-divisible batch/time (exercises tail masking)
    B, T = 10, 300
    forecast = jax.random.normal(k1, (B, T), dtype=jnp.float32)
    target = jax.random.normal(k2, (B, T), dtype=jnp.float32)
    # Force some (forecast, target) = (0, 0) pairs so divide_no_nan's
    # 0/0 -> NaN -> 0 path is exercised.
    zero_sel = jax.random.bernoulli(k3, 0.1, (B, T))
    forecast = jnp.where(zero_sel, 0.0, forecast)
    target = jnp.where(zero_sel, 0.0, target)
    mask = jax.random.bernoulli(k4, 0.8, (B, T)).astype(jnp.float32)

    insample = jnp.zeros((B, T), dtype=jnp.float32)  # unused by forward
    freq = 1

    loss = smape_loss(insample, freq, forecast, target, mask)
    loss = jax.block_until_ready(loss)
    ref = _reference(forecast, target, mask)
    assert jnp.allclose(loss, ref, rtol=1e-5, atol=1e-5), (loss, ref)

    # Case 2: multiple grid steps along both axes (small explicit tiles) + time tail
    B2, T2 = 24, 640
    f2 = jax.random.normal(jax.random.PRNGKey(1), (B2, T2), dtype=jnp.float32)
    t2 = jax.random.normal(jax.random.PRNGKey(2), (B2, T2), dtype=jnp.float32)
    m2 = jax.random.bernoulli(jax.random.PRNGKey(3), 0.7, (B2, T2)).astype(jnp.float32)
    loss2 = smape_loss(None, 1, f2, t2, m2, batch_tile=8, time_tile=256)
    loss2 = jax.block_until_ready(loss2)
    ref2 = _reference(f2, t2, m2)
    assert jnp.allclose(loss2, ref2, rtol=1e-5, atol=1e-5), (loss2, ref2)

    print("KERNEL_OK")
</pallas_src>

<mosaic_0001>
module attributes {stable_mosaic.version = 11 : i64} {
  func.func @_smape_kernel(%arg0: i32, %arg1: i32, %arg2: memref<16x384xf32, #tpu.memory_space<vmem>>, %arg3: memref<16x384xf32, #tpu.memory_space<vmem>>, %arg4: memref<16x384xf32, #tpu.memory_space<vmem>>, %arg5: memref<1x1x1xf32, #tpu.memory_space<vmem>>, %arg6: memref<16x384xf32, #tpu.memory_space<vmem>>) attributes {dimension_semantics = [#tpu.dimension_semantics<parallel>, #tpu.dimension_semantics<arbitrary>], iteration_bounds = array<i64: 1, 1>, scalar_prefetch = 0 : i64, scratch_operands = 1 : i64, tpu.core_type = #tpu.core_type<tc>, window_params = [{transform_indices = @transform_0, window_bounds = array<i64: 16, 384>}, {transform_indices = @transform_1, window_bounds = array<i64: 16, 384>}, {transform_indices = @transform_2, window_bounds = array<i64: 16, 384>}, {transform_indices = @transform_3, window_bounds = array<i64: 1, 1, 1>}]} {
    %c0_i32 = arith.constant 0 : i32
    %0 = arith.cmpi eq, %arg1, %c0_i32 : i32
    %1 = arith.extui %0 : i1 to i32
    %c0_i32_0 = arith.constant 0 : i32
    %2 = arith.cmpi ne, %1, %c0_i32_0 : i32
    scf.if %2 {
      %cst_14 = arith.constant 0.000000e+00 : f32
      %40 = vector.broadcast %cst_14 : f32 to vector<16x384xf32>
      %c0_15 = arith.constant 0 : index
      %c0_16 = arith.constant 0 : index
      %41 = vector.load %arg6[%c0_15, %c0_16] : memref<16x384xf32, #tpu.memory_space<vmem>>, vector<16x384xf32>
      tpu.vector_store %arg6[%c0_15, %c0_16], %40 {strides = array<i32>} : memref<16x384xf32, #tpu.memory_space<vmem>>, vector<16x384xf32>,
    } else {
    }
    %c0 = arith.constant 0 : index
    %c0_1 = arith.constant 0 : index
    %3 = vector.load %arg2[%c0, %c0_1] : memref<16x384xf32, #tpu.memory_space<vmem>>, vector<16x384xf32>
    %c0_2 = arith.constant 0 : index
    %c0_3 = arith.constant 0 : index
    %4 = vector.load %arg3[%c0_2, %c0_3] : memref<16x384xf32, #tpu.memory_space<vmem>>, vector<16x384xf32>
    %c0_4 = arith.constant 0 : index
    %c0_5 = arith.constant 0 : index
    %5 = vector.load %arg4[%c0_4, %c0_5] : memref<16x384xf32, #tpu.memory_space<vmem>>, vector<16x384xf32>
    %6 = arith.subf %3, %4 : vector<16x384xf32>
    %7 = math.absf %6 : vector<16x384xf32>
    %8 = math.absf %3 : vector<16x384xf32>
    %9 = math.absf %4 : vector<16x384xf32>
    %10 = arith.addf %8, %9 : vector<16x384xf32>
    %11 = arith.divf %7, %10 : vector<16x384xf32>
    %12 = arith.cmpf one, %11, %11 : vector<16x384xf32>
    %cst = arith.constant 0x7F800000 : f32
    %13 = vector.broadcast %cst : f32 to vector<16x384xf32>
    %14 = arith.cmpf oeq, %11, %13 : vector<16x384xf32>
    %15 = arith.ori %12, %14 : vector<16x384xi1>
    %16 = arith.mulf %11, %5 : vector<16x384xf32>
    %cst_6 = arith.constant 0.000000e+00 : f32
    %17 = vector.broadcast %cst_6 : f32 to vector<16x384xf32>
    %18 = arith.select %15, %17, %16 : vector<16x384xi1>, vector<16x384xf32>
    %19 = tpu.iota {dimensions = array<i32: 0>} : vector<16x384xi32>
    %c16_i32 = arith.constant 16 : i32
    %20 = arith.muli %arg0, %c16_i32 : i32
    %21 = vector.broadcast %20 : i32 to vector<16x384xi32>
    %22 = arith.addi %19, %21 : vector<16x384xi32>
    %c10_i32 = arith.constant 10 : i32
    %23 = vector.broadcast %c10_i32 : i32 to vector<16x384xi32>
    %24 = arith.cmpi slt, %22, %23 : vector<16x384xi32>
    %25 = tpu.iota {dimensions = array<i32: 1>} : vector<16x384xi32>
    %c384_i32 = arith.constant 384 : i32
    %26 = arith.muli %arg1, %c384_i32 : i32
    %27 = vector.broadcast %26 : i32 to vector<16x384xi32>
    %28 = arith.addi %25, %27 : vector<16x384xi32>
    %c300_i32 = arith.constant 300 : i32
    %29 = vector.broadcast %c300_i32 : i32 to vector<16x384xi32>
    %30 = arith.cmpi slt, %28, %29 : vector<16x384xi32>
    %31 = arith.andi %24, %30 : vector<16x384xi1>
    %cst_7 = arith.constant 0.000000e+00 : f32
    %32 = vector.broadcast %cst_7 : f32 to vector<16x384xf32>
    %33 = arith.select %31, %18, %32 : vector<16x384xi1>, vector<16x384xf32>
    %c0_8 = arith.constant 0 : index
    %c0_9 = arith.constant 0 : index
    %34 = vector.load %arg6[%c0_8, %c0_9] : memref<16x384xf32, #tpu.memory_space<vmem>>, vector<16x384xf32>
    %35 = arith.addf %34, %33 : vector<16x384xf32>
    %c0_10 = arith.constant 0 : index
    %c0_11 = arith.constant 0 : index
    %36 = vector.load %arg6[%c0_10, %c0_11] : memref<16x384xf32, #tpu.memory_space<vmem>>, vector<16x384xf32>
    tpu.vector_store %arg6[%c0_10, %c0_11], %35 {strides = array<i32>} : memref<16x384xf32, #tpu.memory_space<vmem>>, vector<16x384xf32>,
    %c0_i32_12 = arith.constant 0 : i32
    %37 = arith.cmpi eq, %arg1, %c0_i32_12 : i32
    %38 = arith.extui %37 : i1 to i32
    %c0_i32_13 = arith.constant 0 : i32
    %39 = arith.cmpi ne, %38, %c0_i32_13 : i32
    scf.if %39 {
      %c0_14 = arith.constant 0 : index
      %c0_15 = arith.constant 0 : index
      %40 = vector.load %arg6[%c0_14, %c0_15] : memref<16x384xf32, #tpu.memory_space<vmem>>, vector<16x384xf32>
      %41 = vector.shape_cast %40 : vector<16x384xf32> to vector<1x16x384xf32>
      %cst_16 = arith.constant dense<0.000000e+00> : vector<1xf32>
      %42 = vector.multi_reduction <add>, %41, %cst_16 [1, 2] : vector<1x16x384xf32> to vector<1xf32>
      %43 = vector.shape_cast %42 : vector<1xf32> to vector<1x1x1xf32>
      %44 = vector.extract %43[0, 0, 0] : f32 from vector<1x1x1xf32>
      %45 = vector.broadcast %44 : f32 to vector<1x1x1xf32>
      %c0_17 = arith.constant 0 : index
      %c0_18 = arith.constant 0 : index
      %c0_19 = arith.constant 0 : index
      %46 = vector.load %arg5[%c0_17, %c0_18, %c0_19] : memref<1x1x1xf32, #tpu.memory_space<vmem>>, vector<1x1x1xf32>
      tpu.vector_store %arg5[%c0_17, %c0_18, %c0_19], %45 {strides = array<i32>} : memref<1x1x1xf32, #tpu.memory_space<vmem>>, vector<1x1x1xf32>,
    } else {
    }
    return
  }
  func.func @transform_0(%arg0: i32, %arg1: i32) -> (i32, i32) {
    %c0_i32 = arith.constant 0 : i32
    return %arg0, %arg1 : i32, i32
  }
  func.func @transform_1(%arg0: i32, %arg1: i32) -> (i32, i32) {
    %c0_i32 = arith.constant 0 : i32
    return %arg0, %arg1 : i32, i32
  }
  func.func @transform_2(%arg0: i32, %arg1: i32) -> (i32, i32) {
    %c0_i32 = arith.constant 0 : i32
    return %arg0, %arg1 : i32, i32
  }
  func.func @transform_3(%arg0: i32, %arg1: i32) -> (i32, i32, i32) {
    %c0_i32 = arith.constant 0 : i32
    %c0_i32_0 = arith.constant 0 : i32
    %c0_i32_1 = arith.constant 0 : i32
    return %arg0, %c0_i32, %c0_i32_0 : i32, i32, i32
  }
}

</mosaic_0001>

<bundles_post_ra>
// kernel: tpu_custom_call.1
= control target key start
LH: loop header
LB: loop body
LE: loop exit
PB: predicated region body
PF: predicated region fallthrough
CT: control target
= control target key end

     0   :  { %8 = vsyncpa [#allocation4], 0  ;;  %s476_s0 = inlined_call_operand.hbm [shape: f32[10,300], index: 0, kind: input, shape index: {}]   ;;  %s477_s1 = inlined_call_operand.hbm [shape: f32[10,300], index: 1, kind: input, shape index: {}]   ;;  %s478_s2 = inlined_call_operand.hbm [shape: f32[10,300], index: 2, kind: input, shape index: {}]   ;;  %s479_s3 = inlined_call_operand.hbm [shape: f32[1,1,1], index: 3, kind: output, shape index: {}]  }
   0x1   :  { %9 = vsyncpa [#allocation7], 0 }
   0x2   :  { %10 = vsyncpa [#allocation5], 0  ;;  %s363_s12 = smov [#allocation6]   ;;  %s364_s14 = smov [#allocation3]  }
   0x3   :  { %s28_s13 = sshll.u32 %s363_s12, 4  ;;  %s16_s15 = sshll.u32 %s364_s14, 4  ;;  %s29_s13 = int_to_ptr.vmem [resolvable:$true] %s28_s13  ;;  %s389_s15 = int_to_ptr.vmem [resolvable:$true] %s16_s15 }
   0x4   :  { %s269_s18 = scalar_lea.hbm %s477_s1, 768 }
   0x5   :  { %p270_p0 = scmp.ne.s32.totalorder %s477_s1, %s269_s18  ;;  %p273_p1 = scmp.lt.u32.totalorder %s269_s18, %s477_s1 }
   0x7   :  { %p275_p2 = pnand %p273_p1, %p270_p0 }
   0x9   :  { %278 = shalt.err (!%p275_p2)
}
   0xa   :  { %s279_s23 = scalar_lea.vmem %s29_s13, 768  ;;  %p284_p4 = scmp.lt.s32.totalorder %s29_s13, %s29_s13 }
   0xb   :  { %p280_p3 = scmp.ne.s32.totalorder %s29_s13, %s279_s23  ;;  %p285_p5 = scmp.lt.s32.totalorder %s279_s23, %s279_s23 }
   0xd   :  { %p286_p6 = por %p285_p5, %p284_p4 }
   0xf   :  { %p287_p7 = pnand %p286_p6, %p280_p3 }
  0x11   :  { %290 = shalt.err (!%p287_p7)
}
  0x12   :  { %s365_s24 = smov 384   ;;  %s366_s25 = smov 24  }
  0x13   :  { %34 = dma.hbm_to_vmem [thread:$0]  %s477_s1, 768, %s29_s13, [#allocation7], %s365_s24, %s365_s24, %s366_s25  }
  0x14   :  { %s291_s30 = scalar_lea.hbm %s476_s0, 768 }
  0x15   :  { %p292_p8 = scmp.ne.s32.totalorder %s476_s0, %s291_s30  ;;  %p295_p9 = scmp.lt.u32.totalorder %s291_s30, %s476_s0 }
  0x17   :  { %p297_p10 = pnand %p295_p9, %p292_p8 }
  0x19   :  { %300 = shalt.err (!%p297_p10)
}
  0x1a   :  { %s301_s8 = scalar_lea.vmem %s389_s15, 768  ;;  %p306_p12 = scmp.lt.s32.totalorder %s389_s15, %s389_s15 }
  0x1b   :  { %p302_p11 = scmp.ne.s32.totalorder %s389_s15, %s301_s8  ;;  %p307_p13 = scmp.lt.s32.totalorder %s301_s8, %s301_s8 }
  0x1d   :  { %p308_p0 = por %p307_p13, %p306_p12 }
  0x1f   :  { %p309_p1 = pnand %p308_p0, %p302_p11 }
  0x21   :  { %312 = shalt.err (!%p309_p1)
}
  0x22   :  { %22 = dma.hbm_to_vmem [thread:$0]  %s476_s0, 768, %s389_s15, [#allocation4], %s365_s24, %s365_s24, %s366_s25  }
  0x23   :  { %s367_s10 = smov [#allocation8]   ;;  %s313_s14 = scalar_lea.hbm %s478_s2, 768 }
  0x24   :  { %s40_s11 = sshll.u32 %s367_s10, 4  ;;  %p314_p2 = scmp.ne.s32.totalorder %s478_s2, %s313_s14  ;;  %s41_s11 = int_to_ptr.vmem [resolvable:$true] %s40_s11 }
  0x25   :  { %p317_p3 = scmp.lt.u32.totalorder %s313_s14, %s478_s2 }
  0x27   :  { %p319_p4 = pnand %p317_p3, %p314_p2 }
  0x29   :  { %322 = shalt.err (!%p319_p4)
}
  0x2a   :  { %s323_s20 = scalar_lea.vmem %s41_s11, 768  ;;  %p328_p6 = scmp.lt.s32.totalorder %s41_s11, %s41_s11 }
  0x2b   :  { %p324_p5 = scmp.ne.s32.totalorder %s41_s11, %s323_s20  ;;  %p329_p7 = scmp.lt.s32.totalorder %s323_s20, %s323_s20 }
  0x2d   :  { %p330_p8 = por %p329_p7, %p328_p6 }
  0x2f   :  { %p331_p9 = pnand %p330_p8, %p324_p5 }
  0x31   :  { %334 = shalt.err (!%p331_p9)
}
  0x32   :  { %46 = dma.hbm_to_vmem [thread:$0]  %s478_s2, 768, %s41_s11, [#allocation7], %s365_s24, %s365_s24, %s366_s25  }
  0x33   :  { %357 = dma.done.wait [#allocation4], 768  }
  0x34   :  { %358 = vsyncadd [#allocation4], 4294966528 }
  0x35   :  { %359 = dma.done.wait [#allocation7], 1536  }
  0x36   :  { %360 = vsyncadd [#allocation7], 4294965760  ;;  %v66_v0 = vld [vmem:[#allocation3] sm:$0xff]  ;;  %v67_v1 = vld [vmem:[#allocation3 + $0x8] sm:$0xff]  ;;  %v156_v29 = vlaneseq  ;;  %s368_s2 = smov [#allocation9]  }
  0x37   :  { %v68_v2 = vld [vmem:[#allocation3 + $0x10] sm:$0xff]  ;;  %v69_v3 = vld [vmem:[#allocation3 + $0x18] sm:$0xff]  ;;  %v70_v4 = vld [vmem:[#allocation3 + $0x20] sm:$0xff]  ;;  %v96_v9 = vand.u32 2147483647, %v66_v0  ;;  %s239_s21 = sshll.u32 %s368_s2, 4  ;;  %s240_s21 = int_to_ptr.vmem [resolvable:$true] %s239_s21 }
  0x38   :  { %v71_v5 = vld [vmem:[#allocation3 + $0x28] sm:$0xff]  ;;  %v72_v6 = vld [vmem:[#allocation6] sm:$0xff]  ;;  %v73_v7 = vld [vmem:[#allocation6 + $0x8] sm:$0xff]  ;;  %v97_v13 = vand.u32 2147483647, %v67_v1  ;;  %v157_v33 = vshrl.u32 %v156_v29, 7  ;;  %p340_p11 = scmp.lt.s32.totalorder %s240_s21, %s240_s21 }
  0x39   :  { %v74_v8 = vld [vmem:[#allocation6 + $0x10] sm:$0xff]  ;;  %v75_v10 = vld [vmem:[#allocation6 + $0x18] sm:$0xff]  ;;  %v76_v11 = vld [vmem:[#allocation6 + $0x20] sm:$0xff]  ;;  %v98_v14 = vand.u32 2147483647, %v68_v2  ;;  %v84_v31 = vsub.f32 %v66_v0, %v72_v6  ;;  %v85_v32 = vsub.f32 %v67_v1, %v73_v7  ;;  %v166_v34 = vand.u32 127, %v156_v29 }
  0x3a   :  { %v77_v12 = vld [vmem:[#allocation6 + $0x28] sm:$0xff]  ;;  %v99_v15 = vand.u32 2147483647, %v69_v3  ;;  %v100_v16 = vand.u32 2147483647, %v70_v4  ;;  %v86_v35 = vsub.f32 %v68_v2, %v74_v8  ;;  %v87_v36 = vsub.f32 %v69_v3, %v75_v10  ;;  %v78_v45 = vld [vmem:[#allocation8] sm:$0xff] }
  0x3b   :  { %v101_v17 = vand.u32 2147483647, %v71_v5  ;;  %v102_v18 = vand.u32 2147483647, %v72_v6  ;;  %v103_v19 = vand.u32 2147483647, %v73_v7  ;;  %v88_v37 = vsub.f32 %v70_v4, %v76_v11 }
  0x3c   :  { %v104_v20 = vand.u32 2147483647, %v74_v8  ;;  %v105_v21 = vand.u32 2147483647, %v75_v10  ;;  %v106_v22 = vand.u32 2147483647, %v76_v11  ;;  %v89_v39 = vsub.f32 %v71_v5, %v77_v12 }
  0x3d   :  { %v107_v23 = vand.u32 2147483647, %v77_v12  ;;  %v108_v24 = vadd.f32 %v102_v18, %v96_v9  ;;  %v109_v25 = vadd.f32 %v103_v19, %v97_v13  ;;  %v90_v38 = vand.u32 2147483647, %v84_v31  ;;  %v79_v48 = vld [vmem:[#allocation8 + $0x8] sm:$0xff]  ;;  %v80_v52 = vld [vmem:[#allocation8 + $0x10] sm:$0xff] }
  0x3e   :  { %v110_v26 = vadd.f32 %v104_v20, %v98_v14  ;;  %v111_v27 = vadd.f32 %v105_v21, %v99_v15  ;;  %v112_v28 = vadd.f32 %v106_v22, %v100_v16  ;;  %v91_v40 = vand.u32 2147483647, %v85_v32  ;;  %v81_v56 = vld [vmem:[#allocation8 + $0x18] sm:$0xff]  ;;  %v82_v60 = vld [vmem:[#allocation8 + $0x20] sm:$0xff]  ;;  %v83_v1 = vld [vmem:[#allocation8 + $0x28] sm:$0xff]  ;;  %s335_s23 = scalar_lea.vmem %s240_s21, 16 }
  0x3f   :  { %257 = vrcp.f32 %v108_v24  ;;  %v113_v30 = vadd.f32 %v107_v23, %v101_v17  ;;  %v158_v41 = vadd.s32 8, %v157_v33  ;;  %v168_v42 = vadd.s32 256, %v166_v34  ;;  %p336_p10 = scmp.ne.s32.totalorder %s240_s21, %s335_s23  ;;  %s339_s24 = scalar_lea.vmem %s240_s21, 32 }
  0x40   :  { %259 = vrcp.f32 %v109_v25  ;;  %v92_v43 = vand.u32 2147483647, %v86_v35  ;;  %v93_v46 = vand.u32 2147483647, %v87_v36  ;;  %v94_v49 = vand.u32 2147483647, %v88_v37  ;;  %p341_p12 = scmp.lt.s32.totalorder %s339_s24, %s335_s23 }
  0x41   :  { %261 = vrcp.f32 %v110_v26  ;;  %v95_v53 = vand.u32 2147483647, %v89_v39  ;;  %vm164_vm0 = vcmp.lt.s32.totalorder %v158_v41, 10  ;;  %vm176_vm1 = vcmp.lt.s32.totalorder %v168_v42, 300 }
  0x42   :  { %263 = vrcp.f32 %v111_v27  ;;  %p342_p13 = por %p341_p12, %p340_p11 }
  0x43   :  { %265 = vrcp.f32 %v112_v28 }
  0x44   :  { %267 = vrcp.f32 %v113_v30  ;;  %p343_p0 = pnand %p342_p13, %p336_p10 }
  0x49   :  { %v258_v44 = vpop.eup %257 }
  0x4a   :  { %v260_v47 = vpop.eup %259  ;;  %v115_v50 = vmul.f32 %v258_v44, %v90_v38 }
  0x4b   :  { %v262_v51 = vpop.eup %261  ;;  %v117_v54 = vmul.f32 %v260_v47, %v91_v40 }
  0x4c   :  { %v264_v55 = vpop.eup %263  ;;  %v119_v57 = vmul.f32 %v262_v51, %v92_v43  ;;  %vm126_vm2 = vcmp.ne.f32.partialorder %v115_v50, %v115_v50  ;;  %vm132_vm3 = vcmp.eq.f32.partialorder %v115_v50, inf  ;;  %v144_v58 = vmul.f32 %v115_v50, %v78_v45 }
  0x4d   :  { %v266_v59 = vpop.eup %265  ;;  %v121_v61 = vmul.f32 %v264_v55, %v93_v46  ;;  %vm127_vm4 = vcmp.ne.f32.partialorder %v117_v54, %v117_v54  ;;  %vm133_vm5 = vcmp.eq.f32.partialorder %v117_v54, inf  ;;  %vm441_vm6 = vmor %vm126_vm2, %vm132_vm3  ;;  %v145_v63 = vmul.f32 %v117_v54, %v79_v48 }
  0x4e   :  { %v268_v0 = vpop.eup %267  ;;  %v123_v2 = vmul.f32 %v266_v59, %v94_v49  ;;  %vm128_vm7 = vcmp.ne.f32.partialorder %v119_v57, %v119_v57  ;;  %vm134_vm8 = vcmp.eq.f32.partialorder %v119_v57, inf  ;;  %vm445_vm9 = vmor %vm127_vm4, %vm133_vm5  ;;  %v146_v4 = vmul.f32 %v119_v57, %v80_v52 }
  0x4f   :  { %v125_v5 = vmul.f32 %v268_v0, %v95_v53  ;;  %vm129_vm10 = vcmp.ne.f32.partialorder %v121_v61, %v121_v61  ;;  %vm135_vm11 = vcmp.eq.f32.partialorder %v121_v61, inf  ;;  %vm449_vm12 = vmor %vm128_vm7, %vm134_vm8  ;;  %v147_v7 = vmul.f32 %v121_v61, %v81_v56 }
  0x50   :  { %vm130_vm13 = vcmp.ne.f32.partialorder %v123_v2, %v123_v2  ;;  %vm136_vm14 = vcmp.eq.f32.partialorder %v123_v2, inf  ;;  %vm141_vm15 = vmor %vm129_vm10, %vm135_vm11  ;;  %v148_v8 = vmul.f32 %v123_v2, %v82_v60  ;;  %v150_v9 = vsel %vm441_vm6, 0.0, %v144_v58 }
  0x51   :  { %vm131_vm2 = vcmp.ne.f32.partialorder %v125_v5, %v125_v5  ;;  %vm137_vm3 = vcmp.eq.f32.partialorder %v125_v5, inf  ;;  %vm142_vm4 = vmor %vm130_vm13, %vm136_vm14  ;;  %v149_v10 = vmul.f32 %v125_v5, %v83_v1  ;;  %v151_v11 = vsel %vm445_vm9, 0.0, %v145_v63 }
  0x52   :  { %vm143_vm5 = vmor %vm131_vm2, %vm137_vm3  ;;  %v152_v12 = vsel %vm449_vm12, 0.0, %v146_v4  ;;  %v153_v13 = vsel %vm141_vm15, 0.0, %v147_v7  ;;  %v154_v14 = vsel %vm142_vm4, 0.0, %v148_v8  ;;  %v216_v15 = vadd.f32 %v151_v11, %v150_v9 }
  0x53   :  { %v185_v16 = vsel %vm176_vm1, %v152_v12, 0.0  ;;  %v186_v17 = vsel %vm164_vm0, %v153_v13, 0.0  ;;  %v155_v18 = vsel %vm143_vm5, 0.0, %v149_v10  ;;  %vm182_vm6 = vmand %vm164_vm0, %vm176_vm1  ;;  %v187_v20 = vsel %vm164_vm0, %v154_v14, 0.0 }
  0x54   :  { %v217_v19 = vadd.f32 %v216_v15, %v185_v16  ;;  %v188_v22 = vsel %vm182_vm6, %v155_v18, 0.0  ;;  %vm231_vm7 = vcmask 0  }
  0x56   :  { %v218_v21 = vadd.f32 %v217_v19, %v186_v17 }
  0x58   :  { %v219_v23 = vadd.f32 %v218_v21, %v187_v20 }
  0x5a   :  { %v220_v24 = vadd.f32 %v219_v23, %v188_v22 }
  0x5c   :  { %221 = vadd.xlane.f32.xlu0 %v220_v24 }
  0xe9   :  { %v222_v25 = vpop.xlane.xlu0 %221 }
  0xea   :  { %v223_v26 = vrot.slane %v222_v25, 4 }
  0xec   :  { %v224_v27 = vadd.f32 %v223_v26, %v222_v25 }
  0xee   :  { %v225_v28 = vrot.slane %v224_v27, 2 }
  0xf0   :  { %v226_v29 = vadd.f32 %v225_v28, %v224_v27 }
  0xf2   :  { %v227_v30 = vrot.slane %v226_v29, 1 }
  0xf4   :  { %v228_v31 = vadd.f32 %v227_v30, %v226_v29 }
  0xf6   :  { %249 = vpush %v228_v31 }
 0x127   :  { %s250_s22 = spop %249 }
 0x128   :  { %v230_v32 = vstv %s250_s22 }
 0x129   :  { %232 = vst.msk [vmem:[#allocation9] sm:$0x1] %vm231_vm7, %v230_v32 }
 0x12a   :  { %346 = shalt.err (!%p343_p0)
}
 0x12b   :  { %s347_s27 = scalar_lea.hbm %s479_s3, 16 }
 0x12c   :  { %p348_p1 = scmp.ne.s32.totalorder %s479_s3, %s347_s27  ;;  %p351_p2 = scmp.lt.u32.totalorder %s347_s27, %s479_s3 }
 0x12e   :  { %p353_p3 = pnand %p351_p2, %p348_p1 }
 0x130   :  { %356 = shalt.err (!%p353_p3)
}
 0x131   :  { %242 = dma.vmem_to_hbm [thread:$0]  %s240_s21, 16, %s479_s3, [#allocation5]  }
 0x132   :  { %361 = dma.done.wait [#allocation5], 16  }
 0x133   :  { %362 = vsyncadd [#allocation5], 4294967280 }
 0x134   :  { %246 = vsyncpa [#allocation4], 1 }
 0x135   :  { %247 = vsyncpa [#allocation7], 1 }
 0x136   :  { %248 = vsyncpa [#allocation5], 1 }

</bundles_post_ra>
